<compile_context>
chip_gen: v7x
topology: tpu7x:2x2x1
jax: 0.10.0
libtpu: 0.0.40
codegen_flags: <defaults>
</compile_context>

<pallas_src>
import jax
import jax.numpy as jnp
from jax.experimental import pallas as pl
from jax.experimental.pallas import tpu as pltpu

OUT_PAD = 128   # fc3 output lane-padded 10 -> 128 for lane-dense stores
SUB = 16        # sublane granularity (bf16 packing unit; also valid for f32)


def mlp_kernel(x_ref, w1_ref, b1_ref, w2_ref, b2_ref, w3_ref, b3_ref, o_ref):
    x = x_ref[...]
    if x.dtype != jnp.bfloat16:           # fallback path for f32 inputs
        x = x.astype(jnp.bfloat16)

    # fc1 + ReLU  (bf16 MXU matmul, f32 accumulate / bias / ReLU)
    h1 = jnp.dot(x, w1_ref[...], preferred_element_type=jnp.float32) + b1_ref[...]
    h1 = jnp.maximum(h1, 0.0)

    # fc2 + ReLU
    h2 = jnp.dot(h1.astype(jnp.bfloat16), w2_ref[...],
                 preferred_element_type=jnp.float32) + b2_ref[...]
    h2 = jnp.maximum(h2, 0.0)

    # fc3 (no activation); output tile is lane-padded to 128 columns
    out = jnp.dot(h2.astype(jnp.bfloat16), w3_ref[...],
                  preferred_element_type=jnp.float32) + b3_ref[...]
    o_ref[...] = out.astype(o_ref.dtype)   # bf16 store: halves output HBM bytes


def _round_up(v, m):
    return ((v + m - 1) // m) * m


def net_forward(x, params, *, tile_b=2048, store_dtype=jnp.bfloat16):
    """x: [B, 256] (f32 or bf16). params: f32 (w1,b1,w2,b2,w3,b3), W stored [in, out].

    Returns f32 [B, 10], matching the PyTorch module's forward semantics
    (bf16 matmuls with f32 accumulation inside the kernel).
    """
    w1, b1, w2, b2, w3, b3 = params
    B, d_in = x.shape
    n_out = w3.shape[1]

    # Lane-pad fc3 to OUT_PAD output columns (zeros -> exact math).
    w3p = jnp.zeros((w3.shape[0], OUT_PAD), w3.dtype).at[:, :n_out].set(w3)
    b3p = jnp.zeros((1, OUT_PAD), b3.dtype).at[:, :n_out].set(b3)

    # bf16 weights (halved HBM bytes, native MXU bf16 path); biases stay f32.
    w1b = w1.astype(jnp.bfloat16)
    w2b = w2.astype(jnp.bfloat16)
    w3b = w3p.astype(jnp.bfloat16)

    # --- batch tiling --------------------------------------------------------
    tile_b = max(SUB, _round_up(int(tile_b), SUB))
    if B > SUB:
        # >= 2 grid steps so the "parallel" batch axis can span both v7x TCs.
        tile_b = min(tile_b, _round_up(pl.cdiv(B, 2), SUB))
    tile_b = min(tile_b, _round_up(B, SUB))        # never larger than padded batch
    b_pad = _round_up(B, tile_b)
    if b_pad != B:
        x = jnp.pad(x, ((0, b_pad - B), (0, 0)))

    def call(weight_pipeline_mode):
        def wspec(arr):
            return pl.BlockSpec(arr.shape, lambda i: (0, 0),
                                pipeline_mode=weight_pipeline_mode)

        return pl.pallas_call(
            mlp_kernel,
            out_shape=jax.ShapeDtypeStruct((b_pad, OUT_PAD), store_dtype),
            grid=(b_pad // tile_b,),
            in_specs=[
                pl.BlockSpec((tile_b, d_in), lambda i: (i, 0)),  # x: batch-tiled
                wspec(w1b), wspec(b1),                           # pinned weights/biases
                wspec(w2b), wspec(b2),
                wspec(w3b), wspec(b3p),
            ],
            out_specs=pl.BlockSpec((tile_b, OUT_PAD), lambda i: (i, 0)),
            compiler_params=pltpu.CompilerParams(
                dimension_semantics=("parallel",),   # v7x: shard batch tiles over 2 TCs
                vmem_limit_bytes=32 * 1024 * 1024,   # headroom on v5e's 16 MiB default
            ),
        )(x, w1b, b1, w2b, b2, w3b, b3p)

    try:
        # Constant index_map -> single-buffer the pinned weights (frees ~130 KB
        # VMEM and useless DMA descriptor work).
        out_padded = call(pl.Buffered(1))
    except Exception:
        # Fallback: default double-buffering (still correct, tiny VMEM cost).
        out_padded = call(None)

    return out_padded[:B, :n_out].astype(jnp.float32)


def init_params(key):
    # Deterministic init mimicking nn.Linear's uniform(-1/sqrt(fan_in), +1/sqrt(fan_in)).
    def linear(key, fan_in, fan_out):
        kw, kb = jax.random.split(key)
        bound = 1.0 / jnp.sqrt(fan_in)
        w = jax.random.uniform(kw, (fan_in, fan_out), jnp.float32, -bound, bound)
        b = jax.random.uniform(kb, (1, fan_out), jnp.float32, -bound, bound)
        return w, b

    k1, k2, k3 = jax.random.split(key, 3)
    w1, b1 = linear(k1, 256, 128)
    w2, b2 = linear(k2, 128, 128)
    w3, b3 = linear(k3, 128, 10)
    return (w1, b1, w2, b2, w3, b3)


if __name__ == "__main__":
    key = jax.random.PRNGKey(0)
    k_x, k_p = jax.random.split(key)

    B = 8
    x = jax.random.normal(k_x, (B, 256), jnp.float32)
    params = init_params(k_p)

    out = net_forward(x, params)
    jax.block_until_ready(out)
    assert out.shape == (B, 10)

    w1, b1, w2, b2, w3, b3 = params

    # Reference 1: same mixed-precision math in plain JAX (bf16 dots, f32 accum).
    def mixed_ref(xv):
        h = jnp.dot(xv.astype(jnp.bfloat16), w1.astype(jnp.bfloat16),
                    preferred_element_type=jnp.float32) + b1
        h = jnp.maximum(h, 0.0)
        h = jnp.dot(h.astype(jnp.bfloat16), w2.astype(jnp.bfloat16),
                    preferred_element_type=jnp.float32) + b2
        h = jnp.maximum(h, 0.0)
        return jnp.dot(h.astype(jnp.bfloat16), w3.astype(jnp.bfloat16),
                       preferred_element_type=jnp.float32) + b3

    ref_mixed = mixed_ref(x)
    assert jnp.allclose(out, ref_mixed, atol=2e-2, rtol=2e-2), "mixed-precision ref mismatch"

    # Reference 2: full-f32 PyTorch math (loose tolerance: bf16 weights + bf16 output store).
    ref_f32 = jnp.maximum(x @ w1 + b1, 0.0)
    ref_f32 = jnp.maximum(ref_f32 @ w2 + b2, 0.0)
    ref_f32 = ref_f32 @ w3 + b3
    assert jnp.allclose(out, ref_f32, atol=8e-2, rtol=8e-2), "f32 ref mismatch"

    # Exercise the bf16-input fast path (biggest-lever interface option) with an
    # odd batch that forces batch padding and a 2-step grid.
    xb = jax.random.normal(jax.random.PRNGKey(1), (33, 256)).astype(jnp.bfloat16)
    out_b = net_forward(xb, params)
    jax.block_until_ready(out_b)
    assert out_b.shape == (33, 10)
    ref_b = mixed_ref(xb.astype(jnp.float32))
    assert jnp.allclose(out_b, ref_b, atol=5e-2, rtol=5e-2), "bf16-input path mismatch"

    print("KERNEL_OK")
</pallas_src>

<mosaic_0001>
module attributes {stable_mosaic.version = 11 : i64} {
  func.func @mlp_kernel(%arg0: i32, %arg1: memref<16x256xf32, #tpu.memory_space<vmem>>, %arg2: memref<256x128xbf16, #tpu.memory_space<vmem>>, %arg3: memref<1x128xf32, #tpu.memory_space<vmem>>, %arg4: memref<128x128xbf16, #tpu.memory_space<vmem>>, %arg5: memref<1x128xf32, #tpu.memory_space<vmem>>, %arg6: memref<128x128xbf16, #tpu.memory_space<vmem>>, %arg7: memref<1x128xf32, #tpu.memory_space<vmem>>, %arg8: memref<16x128xbf16, #tpu.memory_space<vmem>>) attributes {dimension_semantics = [#tpu.dimension_semantics<parallel>], iteration_bounds = array<i64: 1>, scalar_prefetch = 0 : i64, scratch_operands = 0 : i64, tpu.core_type = #tpu.core_type<tc>, window_params = [{transform_indices = @transform_0, window_bounds = array<i64: 16, 256>}, {pipeline_mode = #tpu.pipeline_mode<synchronous>, transform_indices = @transform_1, window_bounds = array<i64: 256, 128>}, {pipeline_mode = #tpu.pipeline_mode<synchronous>, transform_indices = @transform_2, window_bounds = array<i64: 1, 128>}, {pipeline_mode = #tpu.pipeline_mode<synchronous>, transform_indices = @transform_3, window_bounds = array<i64: 128, 128>}, {pipeline_mode = #tpu.pipeline_mode<synchronous>, transform_indices = @transform_4, window_bounds = array<i64: 1, 128>}, {pipeline_mode = #tpu.pipeline_mode<synchronous>, transform_indices = @transform_5, window_bounds = array<i64: 128, 128>}, {pipeline_mode = #tpu.pipeline_mode<synchronous>, transform_indices = @transform_6, window_bounds = array<i64: 1, 128>}, {transform_indices = @transform_7, window_bounds = array<i64: 16, 128>}]} {
    %c0 = arith.constant 0 : index
    %c0_0 = arith.constant 0 : index
    %0 = vector.load %arg1[%c0, %c0_0] : memref<16x256xf32, #tpu.memory_space<vmem>>, vector<16x256xf32>
    %1 = arith.truncf %0 : vector<16x256xf32> to vector<16x256xbf16>
    %c0_1 = arith.constant 0 : index
    %c0_2 = arith.constant 0 : index
    %2 = vector.load %arg2[%c0_1, %c0_2] : memref<256x128xbf16, #tpu.memory_space<vmem>>, vector<256x128xbf16>
    %cst = arith.constant dense<0.000000e+00> : vector<16x128xf32>
    %3 = tpu.matmul %1, %2, %cst {dimension_numbers = #tpu.dot_dimension_numbers<[1], [0], [0], [1], [0, 0, 1, 1], [], []>} : vector<16x256xbf16>, vector<256x128xbf16>, vector<16x128xf32> -> vector<16x128xf32>
    %c0_3 = arith.constant 0 : index
    %c0_4 = arith.constant 0 : index
    %4 = vector.load %arg3[%c0_3, %c0_4] : memref<1x128xf32, #tpu.memory_space<vmem>>, vector<1x128xf32>
    %5 = vector.broadcast %4 : vector<1x128xf32> to vector<16x128xf32>
    %6 = arith.addf %3, %5 : vector<16x128xf32>
    %cst_5 = arith.constant 0.000000e+00 : f32
    %7 = vector.broadcast %cst_5 : f32 to vector<16x128xf32>
    %8 = arith.maximumf %6, %7 : vector<16x128xf32>
    %9 = arith.truncf %8 : vector<16x128xf32> to vector<16x128xbf16>
    %c0_6 = arith.constant 0 : index
    %c0_7 = arith.constant 0 : index
    %10 = vector.load %arg4[%c0_6, %c0_7] : memref<128x128xbf16, #tpu.memory_space<vmem>>, vector<128x128xbf16>
    %cst_8 = arith.constant dense<0.000000e+00> : vector<16x128xf32>
    %11 = tpu.matmul %9, %10, %cst_8 {dimension_numbers = #tpu.dot_dimension_numbers<[1], [0], [0], [1], [0, 0, 1, 1], [], []>} : vector<16x128xbf16>, vector<128x128xbf16>, vector<16x128xf32> -> vector<16x128xf32>
    %c0_9 = arith.constant 0 : index
    %c0_10 = arith.constant 0 : index
    %12 = vector.load %arg5[%c0_9, %c0_10] : memref<1x128xf32, #tpu.memory_space<vmem>>, vector<1x128xf32>
    %13 = vector.broadcast %12 : vector<1x128xf32> to vector<16x128xf32>
    %14 = arith.addf %11, %13 : vector<16x128xf32>
    %cst_11 = arith.constant 0.000000e+00 : f32
    %15 = vector.broadcast %cst_11 : f32 to vector<16x128xf32>
    %16 = arith.maximumf %14, %15 : vector<16x128xf32>
    %17 = arith.truncf %16 : vector<16x128xf32> to vector<16x128xbf16>
    %c0_12 = arith.constant 0 : index
    %c0_13 = arith.constant 0 : index
    %18 = vector.load %arg6[%c0_12, %c0_13] : memref<128x128xbf16, #tpu.memory_space<vmem>>, vector<128x128xbf16>
    %cst_14 = arith.constant dense<0.000000e+00> : vector<16x128xf32>
    %19 = tpu.matmul %17, %18, %cst_14 {dimension_numbers = #tpu.dot_dimension_numbers<[1], [0], [0], [1], [0, 0, 1, 1], [], []>} : vector<16x128xbf16>, vector<128x128xbf16>, vector<16x128xf32> -> vector<16x128xf32>
    %c0_15 = arith.constant 0 : index
    %c0_16 = arith.constant 0 : index
    %20 = vector.load %arg7[%c0_15, %c0_16] : memref<1x128xf32, #tpu.memory_space<vmem>>, vector<1x128xf32>
    %21 = vector.broadcast %20 : vector<1x128xf32> to vector<16x128xf32>
    %22 = arith.addf %19, %21 : vector<16x128xf32>
    %23 = arith.truncf %22 : vector<16x128xf32> to vector<16x128xbf16>
    %c0_17 = arith.constant 0 : index
    %c0_18 = arith.constant 0 : index
    %24 = vector.load %arg8[%c0_17, %c0_18] : memref<16x128xbf16, #tpu.memory_space<vmem>>, vector<16x128xbf16>
    tpu.vector_store %arg8[%c0_17, %c0_18], %23 {strides = array<i32>} : memref<16x128xbf16, #tpu.memory_space<vmem>>, vector<16x128xbf16>,
    return
  }
  func.func @transform_0(%arg0: i32) -> (i32, i32) {
    %c0_i32 = arith.constant 0 : i32
    %c0_i32_0 = arith.constant 0 : i32
    return %arg0, %c0_i32 : i32, i32
  }
  func.func @transform_1(%arg0: i32) -> (i32, i32) {
    %c0_i32 = arith.constant 0 : i32
    %c0_i32_0 = arith.constant 0 : i32
    %c0_i32_1 = arith.constant 0 : i32
    return %c0_i32, %c0_i32_0 : i32, i32
  }
  func.func @transform_2(%arg0: i32) -> (i32, i32) {
    %c0_i32 = arith.constant 0 : i32
    %c0_i32_0 = arith.constant 0 : i32
    %c0_i32_1 = arith.constant 0 : i32
    return %c0_i32, %c0_i32_0 : i32, i32
  }
  func.func @transform_3(%arg0: i32) -> (i32, i32) {
    %c0_i32 = arith.constant 0 : i32
    %c0_i32_0 = arith.constant 0 : i32
    %c0_i32_1 = arith.constant 0 : i32
    return %c0_i32, %c0_i32_0 : i32, i32
  }
  func.func @transform_4(%arg0: i32) -> (i32, i32) {
    %c0_i32 = arith.constant 0 : i32
    %c0_i32_0 = arith.constant 0 : i32
    %c0_i32_1 = arith.constant 0 : i32
    return %c0_i32, %c0_i32_0 : i32, i32
  }
  func.func @transform_5(%arg0: i32) -> (i32, i32) {
    %c0_i32 = arith.constant 0 : i32
    %c0_i32_0 = arith.constant 0 : i32
    %c0_i32_1 = arith.constant 0 : i32
    return %c0_i32, %c0_i32_0 : i32, i32
  }
  func.func @transform_6(%arg0: i32) -> (i32, i32) {
    %c0_i32 = arith.constant 0 : i32
    %c0_i32_0 = arith.constant 0 : i32
    %c0_i32_1 = arith.constant 0 : i32
    return %c0_i32, %c0_i32_0 : i32, i32
  }
  func.func @transform_7(%arg0: i32) -> (i32, i32) {
    %c0_i32 = arith.constant 0 : i32
    %c0_i32_0 = arith.constant 0 : i32
    return %arg0, %c0_i32 : i32, i32
  }
}

module attributes {stable_mosaic.version = 11 : i64} {
  func.func @mlp_kernel(%arg0: i32, %arg1: memref<16x256xf32, #tpu.memory_space<vmem>>, %arg2: memref<256x128xbf16, #tpu.memory_space<vmem>>, %arg3: memref<1x128xf32, #tpu.memory_space<vmem>>, %arg4: memref<128x128xbf16, #tpu.memory_space<vmem>>, %arg5: memref<1x128xf32, #tpu.memory_space<vmem>>, %arg6: memref<128x128xbf16, #tpu.memory_space<vmem>>, %arg7: memref<1x128xf32, #tpu.memory_space<vmem>>, %arg8: memref<16x128xbf16, #tpu.memory_space<vmem>>) attributes {dimension_semantics = [#tpu.dimension_semantics<parallel>], iteration_bounds = array<i64: 1>, scalar_prefetch = 0 : i64, scratch_operands = 0 : i64, tpu.core_type = #tpu.core_type<tc>, window_params = [{transform_indices = @transform_0, window_bounds = array<i64: 16, 256>}, {pipeline_mode = #tpu.pipeline_mode<synchronous>, transform_indices = @transform_1, window_bounds = array<i64: 256, 128>}, {pipeline_mode = #tpu.pipeline_mode<synchronous>, transform_indices = @transform_2, window_bounds = array<i64: 1, 128>}, {pipeline_mode = #tpu.pipeline_mode<synchronous>, transform_indices = @transform_3, window_bounds = array<i64: 128, 128>}, {pipeline_mode = #tpu.pipeline_mode<synchronous>, transform_indices = @transform_4, window_bounds = array<i64: 1, 128>}, {pipeline_mode = #tpu.pipeline_mode<synchronous>, transform_indices = @transform_5, window_bounds = array<i64: 128, 128>}, {pipeline_mode = #tpu.pipeline_mode<synchronous>, transform_indices = @transform_6, window_bounds = array<i64: 1, 128>}, {transform_indices = @transform_7, window_bounds = array<i64: 16, 128>}]} {
    %c0 = arith.constant 0 : index
    %c0_0 = arith.constant 0 : index
    %0 = vector.load %arg1[%c0, %c0_0] : memref<16x256xf32, #tpu.memory_space<vmem>>, vector<16x256xf32>
    %1 = arith.truncf %0 : vector<16x256xf32> to vector<16x256xbf16>
    %c0_1 = arith.constant 0 : index
    %c0_2 = arith.constant 0 : index
    %2 = vector.load %arg2[%c0_1, %c0_2] : memref<256x128xbf16, #tpu.memory_space<vmem>>, vector<256x128xbf16>
    %cst = arith.constant dense<0.000000e+00> : vector<16x128xf32>
    %3 = tpu.matmul %1, %2, %cst {dimension_numbers = #tpu.dot_dimension_numbers<[1], [0], [0], [1], [0, 0, 1, 1], [], []>} : vector<16x256xbf16>, vector<256x128xbf16>, vector<16x128xf32> -> vector<16x128xf32>
    %c0_3 = arith.constant 0 : index
    %c0_4 = arith.constant 0 : index
    %4 = vector.load %arg3[%c0_3, %c0_4] : memref<1x128xf32, #tpu.memory_space<vmem>>, vector<1x128xf32>
    %5 = vector.broadcast %4 : vector<1x128xf32> to vector<16x128xf32>
    %6 = arith.addf %3, %5 : vector<16x128xf32>
    %cst_5 = arith.constant 0.000000e+00 : f32
    %7 = vector.broadcast %cst_5 : f32 to vector<16x128xf32>
    %8 = arith.maximumf %6, %7 : vector<16x128xf32>
    %9 = arith.truncf %8 : vector<16x128xf32> to vector<16x128xbf16>
    %c0_6 = arith.constant 0 : index
    %c0_7 = arith.constant 0 : index
    %10 = vector.load %arg4[%c0_6, %c0_7] : memref<128x128xbf16, #tpu.memory_space<vmem>>, vector<128x128xbf16>
    %cst_8 = arith.constant dense<0.000000e+00> : vector<16x128xf32>
    %11 = tpu.matmul %9, %10, %cst_8 {dimension_numbers = #tpu.dot_dimension_numbers<[1], [0], [0], [1], [0, 0, 1, 1], [], []>} : vector<16x128xbf16>, vector<128x128xbf16>, vector<16x128xf32> -> vector<16x128xf32>
    %c0_9 = arith.constant 0 : index
    %c0_10 = arith.constant 0 : index
    %12 = vector.load %arg5[%c0_9, %c0_10] : memref<1x128xf32, #tpu.memory_space<vmem>>, vector<1x128xf32>
    %13 = vector.broadcast %12 : vector<1x128xf32> to vector<16x128xf32>
    %14 = arith.addf %11, %13 : vector<16x128xf32>
    %cst_11 = arith.constant 0.000000e+00 : f32
    %15 = vector.broadcast %cst_11 : f32 to vector<16x128xf32>
    %16 = arith.maximumf %14, %15 : vector<16x128xf32>
    %17 = arith.truncf %16 : vector<16x128xf32> to vector<16x128xbf16>
    %c0_12 = arith.constant 0 : index
    %c0_13 = arith.constant 0 : index
    %18 = vector.load %arg6[%c0_12, %c0_13] : memref<128x128xbf16, #tpu.memory_space<vmem>>, vector<128x128xbf16>
    %cst_14 = arith.constant dense<0.000000e+00> : vector<16x128xf32>
    %19 = tpu.matmul %17, %18, %cst_14 {dimension_numbers = #tpu.dot_dimension_numbers<[1], [0], [0], [1], [0, 0, 1, 1], [], []>} : vector<16x128xbf16>, vector<128x128xbf16>, vector<16x128xf32> -> vector<16x128xf32>
    %c0_15 = arith.constant 0 : index
    %c0_16 = arith.constant 0 : index
    %20 = vector.load %arg7[%c0_15, %c0_16] : memref<1x128xf32, #tpu.memory_space<vmem>>, vector<1x128xf32>
    %21 = vector.broadcast %20 : vector<1x128xf32> to vector<16x128xf32>
    %22 = arith.addf %19, %21 : vector<16x128xf32>
    %23 = arith.truncf %22 : vector<16x128xf32> to vector<16x128xbf16>
    %c0_17 = arith.constant 0 : index
    %c0_18 = arith.constant 0 : index
    %24 = vector.load %arg8[%c0_17, %c0_18] : memref<16x128xbf16, #tpu.memory_space<vmem>>, vector<16x128xbf16>
    tpu.vector_store %arg8[%c0_17, %c0_18], %23 {strides = array<i32>} : memref<16x128xbf16, #tpu.memory_space<vmem>>, vector<16x128xbf16>,
    return
  }
  func.func @transform_0(%arg0: i32) -> (i32, i32) {
    %c0_i32 = arith.constant 0 : i32
    %c0_i32_0 = arith.constant 0 : i32
    return %arg0, %c0_i32 : i32, i32
  }
  func.func @transform_1(%arg0: i32) -> (i32, i32) {
    %c0_i32 = arith.constant 0 : i32
    %c0_i32_0 = arith.constant 0 : i32
    %c0_i32_1 = arith.constant 0 : i32
    return %c0_i32, %c0_i32_0 : i32, i32
  }
  func.func @transform_2(%arg0: i32) -> (i32, i32) {
    %c0_i32 = arith.constant 0 : i32
    %c0_i32_0 = arith.constant 0 : i32
    %c0_i32_1 = arith.constant 0 : i32
    return %c0_i32, %c0_i32_0 : i32, i32
  }
  func.func @transform_3(%arg0: i32) -> (i32, i32) {
    %c0_i32 = arith.constant 0 : i32
    %c0_i32_0 = arith.constant 0 : i32
    %c0_i32_1 = arith.constant 0 : i32
    return %c0_i32, %c0_i32_0 : i32, i32
  }
  func.func @transform_4(%arg0: i32) -> (i32, i32) {
    %c0_i32 = arith.constant 0 : i32
    %c0_i32_0 = arith.constant 0 : i32
    %c0_i32_1 = arith.constant 0 : i32
    return %c0_i32, %c0_i32_0 : i32, i32
  }
  func.func @transform_5(%arg0: i32) -> (i32, i32) {
    %c0_i32 = arith.constant 0 : i32
    %c0_i32_0 = arith.constant 0 : i32
    %c0_i32_1 = arith.constant 0 : i32
    return %c0_i32, %c0_i32_0 : i32, i32
  }
  func.func @transform_6(%arg0: i32) -> (i32, i32) {
    %c0_i32 = arith.constant 0 : i32
    %c0_i32_0 = arith.constant 0 : i32
    %c0_i32_1 = arith.constant 0 : i32
    return %c0_i32, %c0_i32_0 : i32, i32
  }
  func.func @transform_7(%arg0: i32) -> (i32, i32) {
    %c0_i32 = arith.constant 0 : i32
    %c0_i32_0 = arith.constant 0 : i32
    return %arg0, %c0_i32 : i32, i32
  }
}

</mosaic_0001>

<bundles_post_ra>
// kernel: tpu_custom_call.1
= control target key start
LH: loop header
LB: loop body
LE: loop exit
PB: predicated region body
PF: predicated region fallthrough
CT: control target
= control target key end

     0   :  { %12 = vsyncpa [#allocation3], 0  ;;  %s966_s0 = inlined_call_operand.hbm [shape: f32[16,256], index: 0, kind: input, shape index: {}]   ;;  %s967_s1 = inlined_call_operand.hbm [shape: bf16[256,128], index: 1, kind: input, shape index: {}]   ;;  %s968_s2 = inlined_call_operand.vmem [shape: f32[1,128], index: 2, kind: input, shape index: {}]   ;;  %s969_s3 = inlined_call_operand.hbm [shape: bf16[128,128], index: 3, kind: input, shape index: {}]   ;;  %s970_s4 = inlined_call_operand.vmem [shape: f32[1,128], index: 4, kind: input, shape index: {}]   ;;  %s971_s5 = inlined_call_operand.hbm [shape: bf16[128,128], index: 5, kind: input, shape index: {}]   ;;  %s972_s6 = inlined_call_operand.vmem [shape: f32[1,128], index: 6, kind: input, shape index: {}]   ;;  %s973_s7 = inlined_call_operand.hbm [shape: bf16[16,128], index: 7, kind: output, shape index: {}]  }
   0x1   :  { %13 = vsyncpa [#allocation6], 0 }
   0x2   :  { %14 = vsyncpa [#allocation9], 0 }
   0x3   :  { %15 = vsyncpa [#allocation4], 0  ;;  %s809_s24 = smov [#allocation5]   ;;  %s691_s28 = scalar_lea.hbm %s967_s1, 2048 }
   0x4   :  { %s33_s25 = sshll.u32 %s809_s24, 4  ;;  %p692_p0 = scmp.ne.s32.totalorder %s967_s1, %s691_s28  ;;  %s34_s25 = int_to_ptr.vmem [resolvable:$true] %s33_s25 }
   0x5   :  { %p695_p1 = scmp.lt.u32.totalorder %s691_s28, %s967_s1 }
   0x7   :  { %p697_p2 = pnand %p695_p1, %p692_p0 }
   0x9   :  { %700 = shalt.err (!%p697_p2)
}
   0xa   :  { %s701_s10 = scalar_lea.vmem %s34_s25, 2048  ;;  %p706_p4 = scmp.lt.s32.totalorder %s34_s25, %s34_s25 }
   0xb   :  { %p702_p3 = scmp.ne.s32.totalorder %s34_s25, %s701_s10  ;;  %p707_p5 = scmp.lt.s32.totalorder %s701_s10, %s701_s10 }
   0xd   :  { %p708_p6 = por %p707_p5, %p706_p4 }
   0xf   :  { %p709_p7 = pnand %p708_p6, %p702_p3 }
  0x11   :  { %712 = shalt.err (!%p709_p7)
}
  0x12   :  { %s810_s11 = smov 64   ;;  %s811_s12 = smov 4  }
  0x13   :  { %39 = dma.hbm_to_vmem [thread:$0]  %s967_s1, 2048, %s34_s25, [#allocation6], %s810_s11, %s810_s11, %s811_s12  }
  0x14   :  { %s812_s15 = smov [#allocation2]   ;;  %s713_s19 = scalar_lea.hbm %s966_s0, 512 }
  0x15   :  { %s21_s16 = sshll.u32 %s812_s15, 4  ;;  %p714_p8 = scmp.ne.s32.totalorder %s966_s0, %s713_s19  ;;  %s22_s16 = int_to_ptr.vmem [resolvable:$true] %s21_s16 }
  0x16   :  { %p717_p9 = scmp.lt.u32.totalorder %s713_s19, %s966_s0 }
  0x18   :  { %p719_p10 = pnand %p717_p9, %p714_p8 }
  0x1a   :  { %722 = shalt.err (!%p719_p10)
}
  0x1b   :  { %s723_s24 = scalar_lea.vmem %s22_s16, 512  ;;  %p728_p12 = scmp.lt.s32.totalorder %s22_s16, %s22_s16 }
  0x1c   :  { %p724_p11 = scmp.ne.s32.totalorder %s22_s16, %s723_s24  ;;  %p729_p13 = scmp.lt.s32.totalorder %s723_s24, %s723_s24 }
  0x1e   :  { %p730_p0 = por %p729_p13, %p728_p12 }
  0x20   :  { %p731_p1 = pnand %p730_p0, %p724_p11 }
  0x22   :  { %734 = shalt.err (!%p731_p1)
}
  0x23   :  { %s813_s1 = smov 256   ;;  %s814_s25 = smov 16  }
  0x24   :  { %27 = dma.hbm_to_vmem [thread:$0]  %s966_s0, 512, %s22_s16, [#allocation3], %s813_s1, %s813_s1, %s814_s25  }
  0x25   :  { %s815_s28 = smov [#allocation7]   ;;  %s816_s30 = smov [#allocation8]  }
  0x26   :  { %s47_s29 = sshll.u32 %s815_s28, 4  ;;  %s61_s8 = sshll.u32 %s816_s30, 4  ;;  %s48_s29 = int_to_ptr.vmem [resolvable:$true] %s47_s29  ;;  %s887_s8 = int_to_ptr.vmem [resolvable:$true] %s61_s8 }
  0x27   :  { %s735_s13 = scalar_lea.hbm %s969_s3, 1024 }
  0x28   :  { %p736_p2 = scmp.ne.s32.totalorder %s969_s3, %s735_s13  ;;  %p739_p3 = scmp.lt.u32.totalorder %s735_s13, %s969_s3 }
  0x2a   :  { %p741_p4 = pnand %p739_p3, %p736_p2 }
  0x2c   :  { %744 = shalt.err (!%p741_p4)
}
  0x2d   :  { %s745_s0 = scalar_lea.vmem %s48_s29, 1024  ;;  %p750_p6 = scmp.lt.s32.totalorder %s48_s29, %s48_s29 }
  0x2e   :  { %p746_p5 = scmp.ne.s32.totalorder %s48_s29, %s745_s0  ;;  %p751_p7 = scmp.lt.s32.totalorder %s745_s0, %s745_s0 }
  0x30   :  { %p752_p8 = por %p751_p7, %p750_p6 }
  0x32   :  { %p753_p9 = pnand %p752_p8, %p746_p5 }
  0x34   :  { %756 = shalt.err (!%p753_p9)
}
  0x35   :  { %53 = dma.hbm_to_vmem [thread:$0]  %s969_s3, 1024, %s48_s29, [#allocation6], %s810_s11, %s810_s11, %s811_s12  }
  0x36   :  { %s757_s22 = scalar_lea.hbm %s971_s5, 1024 }
  0x37   :  { %p758_p10 = scmp.ne.s32.totalorder %s971_s5, %s757_s22  ;;  %p761_p11 = scmp.lt.u32.totalorder %s757_s22, %s971_s5 }
  0x39   :  { %p763_p12 = pnand %p761_p11, %p758_p10 }
  0x3b   :  { %766 = shalt.err (!%p763_p12)
}
  0x3c   :  { %s767_s26 = scalar_lea.vmem %s887_s8, 1024  ;;  %p772_p0 = scmp.lt.s32.totalorder %s887_s8, %s887_s8 }
  0x3d   :  { %p768_p13 = scmp.ne.s32.totalorder %s887_s8, %s767_s26  ;;  %p773_p1 = scmp.lt.s32.totalorder %s767_s26, %s767_s26 }
  0x3f   :  { %p774_p2 = por %p773_p1, %p772_p0 }
  0x41   :  { %p775_p3 = pnand %p774_p2, %p768_p13 }
  0x43   :  { %778 = shalt.err (!%p775_p3)
}
  0x44   :  { %67 = dma.hbm_to_vmem [thread:$0]  %s971_s5, 1024, %s887_s8, [#allocation9], %s810_s11, %s810_s11, %s811_s12  }
  0x45   :  { %801 = dma.done.wait [#allocation3], 512  }
  0x46   :  { %802 = vsyncadd [#allocation3], 4294966784 }
  0x47   :  { %803 = dma.done.wait [#allocation6], 3072  }
  0x48   :  { %804 = vsyncadd [#allocation6], 4294964224 }
  0x49   :  { %805 = dma.done.wait [#allocation9], 1024  }
  0x4a   :  { %806 = vsyncadd [#allocation9], 4294966272  ;;  %v817_v0 = vmov 0.0   ;;  %v659_v1 = vld [vmem:[#allocation5 + $0x40] sm:$0xff]   ;;  %v661_v3 = vld [vmem:[#allocation5 + $0x48] sm:$0xff]   ;;  %vm818_vm0 = vmmov 0  }
  0x4b   :  { %608 = vmatprep.subr.bf16.mxu1 %v817_v0  ;;  %v660_v2 = vld [vmem:[#allocation5] sm:$0xff]   ;;  %568 = vmatprep.subr.bf16.mxu0 %v659_v1  ;;  %v662_v4 = vld [vmem:[#allocation5 + $0x8] sm:$0xff]   ;;  %v663_v5 = vld [vmem:[#allocation5 + $0x50] sm:$0xff]   ;;  %s819_s9 = smov [#allocation10]  }
  0x4c   :  { %569 = vmatpush3.bf16.msra.mxu0 %v660_v2  ;;  %v664_v6 = vld [vmem:[#allocation5 + $0x10] sm:$0xff]   ;;  %v665_v7 = vld [vmem:[#allocation5 + $0x58] sm:$0xff]   ;;  %v667_v9 = vld [vmem:[#allocation5 + $0x60] sm:$0xff]   ;;  %624 = vmatprep.mubr.msk.bf16.mxu1 %vm818_vm0, %v817_v0  ;;  %s510_s10 = sshll.u32 %s819_s9, 4  ;;  %s511_s10 = int_to_ptr.vmem [resolvable:$true] %s510_s10 }
  0x4d   :  { %570 = vmatprep.subr.bf16.mxu0 %v661_v3  ;;  %v666_v8 = vld [vmem:[#allocation5 + $0x18] sm:$0xff]   ;;  %v668_v10 = vld [vmem:[#allocation5 + $0x20] sm:$0xff]   ;;  %v669_v11 = vld [vmem:[#allocation5 + $0x68] sm:$0xff]   ;;  %p784_p5 = scmp.lt.s32.totalorder %s511_s10, %s511_s10 }
  0x4e   :  { %v84_v12 = vld [vmem:[#allocation2 + $0x8] sm:$0xff]  ;;  %v86_v13 = vld [vmem:[#allocation2 + $0x18] sm:$0xff]  ;;  %v675_v16 = vld [vmem:[#allocation7] sm:$0xff]  }
  0x4f   :  { %v670_v14 = vld [vmem:[#allocation5 + $0x28] sm:$0xff]   ;;  %v88_v15 = vpack.c.bf16 %v86_v13, %v84_v12  ;;  %v671_v17 = vld [vmem:[#allocation5 + $0x70] sm:$0xff]   ;;  %609 = vmatpush3.bf16.msra.mxu1 %v675_v16  ;;  %v673_v20 = vld [vmem:[#allocation5 + $0x78] sm:$0xff]  }
  0x50   :  { %571 = vmatpush3.bf16.msra.mxu0 %v662_v4  ;;  %v676_v18 = vld [vmem:[#allocation7 + $0x8] sm:$0xff]   ;;  %v672_v19 = vld [vmem:[#allocation5 + $0x30] sm:$0xff]   ;;  %610 = vmatprep.subr.bf16.mxu1 %v817_v0  ;;  %v674_v22 = vld [vmem:[#allocation5 + $0x38] sm:$0xff]  }
  0x51   :  { %572 = vmatprep.subr.bf16.mxu0 %v663_v5  ;;  %256 = vmatprep.mubr.bf16.mxu0 %v88_v15  ;;  %v677_v21 = vld [vmem:[#allocation7 + $0x10] sm:$0xff]   ;;  %v83_v23 = vld [vmem:[#allocation2] sm:$0xff]  ;;  %v678_v25 = vld [vmem:[#allocation7 + $0x18] sm:$0xff]  }
  0x52   :  { %v85_v24 = vld [vmem:[#allocation2 + $0x10] sm:$0xff]  ;;  %v679_v27 = vld [vmem:[#allocation7 + $0x20] sm:$0xff]   ;;  %v680_v28 = vld [vmem:[#allocation7 + $0x28] sm:$0xff]  }
  0x53   :  { %611 = vmatpush3.bf16.msra.mxu1 %v676_v18  ;;  %v87_v26 = vpack.c.bf16 %v85_v24, %v83_v23  ;;  %v681_v29 = vld [vmem:[#allocation7 + $0x30] sm:$0xff]   ;;  %v682_v30 = vld [vmem:[#allocation7 + $0x38] sm:$0xff]   ;;  %v683_v31 = vld [vmem:[#allocation8] sm:$0xff]  }
  0x54   :  { %573 = vmatpush3.bf16.msra.mxu0 %v664_v6  ;;  %612 = vmatprep.subr.bf16.mxu1 %v817_v0  ;;  %v684_v32 = vld [vmem:[#allocation8 + $0x8] sm:$0xff]   ;;  %v685_v33 = vld [vmem:[#allocation8 + $0x10] sm:$0xff]   ;;  %v686_v34 = vld [vmem:[#allocation8 + $0x18] sm:$0xff]  }
  0x55   :  { %574 = vmatprep.subr.bf16.mxu0 %v665_v7  ;;  %v687_v35 = vld [vmem:[#allocation8 + $0x20] sm:$0xff]   ;;  %v688_v36 = vld [vmem:[#allocation8 + $0x28] sm:$0xff]   ;;  %v689_v49 = vld [vmem:[#allocation8 + $0x30] sm:$0xff]  }
  0x56   :  { %v524_v38 = vld [vmem:[%s968_s2] ss:$0 sm:$0xff]  ;;  %v690_v50 = vld [vmem:[#allocation8 + $0x38] sm:$0xff]  }
  0x57   :  { %613 = vmatpush3.bf16.msra.mxu1 %v677_v21  ;;  %v541_v51 = vld [vmem:[%s970_s4] ss:$0 sm:$0xff]  ;;  %s779_s4 = scalar_lea.vmem %s511_s10, 128 }
  0x58   :  { %575 = vmatpush3.bf16.msra.mxu0 %v666_v8  ;;  %614 = vmatprep.subr.bf16.mxu1 %v817_v0  ;;  %v550_v61 = vld [vmem:[%s972_s6] ss:$0 sm:$0xff]  ;;  %p780_p4 = scmp.ne.s32.totalorder %s511_s10, %s779_s4  ;;  %p785_p6 = scmp.lt.s32.totalorder %s779_s4, %s779_s4 }
  0x59   :  { %576 = vmatprep.subr.bf16.mxu0 %v667_v9 }
  0x5a   :  { %p786_p7 = por %p785_p6, %p784_p5 }
  0x5b   :  { %615 = vmatpush3.bf16.msra.mxu1 %v678_v25 }
  0x5c   :  { %577 = vmatpush3.bf16.msra.mxu0 %v668_v10  ;;  %616 = vmatprep.subr.bf16.mxu1 %v817_v0  ;;  %p787_p8 = pnand %p786_p7, %p780_p4 }
  0x5d   :  { %578 = vmatprep.subr.bf16.mxu0 %v669_v11 }
  0x5f   :  { %617 = vmatpush3.bf16.msra.mxu1 %v679_v27 }
  0x60   :  { %579 = vmatpush3.bf16.msra.mxu0 %v670_v14  ;;  %618 = vmatprep.subr.bf16.mxu1 %v817_v0 }
  0x61   :  { %580 = vmatprep.subr.bf16.mxu0 %v671_v17 }
  0x63   :  { %619 = vmatpush3.bf16.msra.mxu1 %v680_v28 }
  0x64   :  { %581 = vmatpush3.bf16.msra.mxu0 %v672_v19  ;;  %620 = vmatprep.subr.bf16.mxu1 %v817_v0 }
  0x65   :  { %582 = vmatprep.subr.bf16.mxu0 %v673_v20 }
  0x67   :  { %621 = vmatpush3.bf16.msra.mxu1 %v681_v29 }
  0x68   :  { %583 = vmatpush3.bf16.msra.mxu0 %v674_v22  ;;  %622 = vmatprep.subr.bf16.mxu1 %v817_v0 }
  0x69   :  { %628 = vmatprep.subr.bf16.mxu0 %v817_v0 }
  0x6b   :  { %257 = vmatmul.mubr.bf16.vlgmr.msra.gmra.mrb[0].mxu0 %v87_v26  ;;  %623 = vmatpush3.bf16.msra.mxu1 %v682_v30 }
  0x6c   :  { %644 = vmatprep.mubr.msk.bf16.mxu0 %vm818_vm0, %v817_v0  ;;  %629 = vmatpush3.bf16.msra.mxu0 %v683_v31 }
  0x6d   :  { %630 = vmatprep.subr.bf16.mxu0 %v817_v0 }
  0x70   :  { %631 = vmatpush3.bf16.msra.mxu0 %v684_v32 }
  0x71   :  { %632 = vmatprep.subr.bf16.mxu0 %v817_v0 }
  0x74   :  { %633 = vmatpush3.bf16.msra.mxu0 %v685_v33 }
  0x75   :  { %634 = vmatprep.subr.bf16.mxu0 %v817_v0 }
  0x78   :  { %635 = vmatpush3.bf16.msra.mxu0 %v686_v34 }
  0x79   :  { %636 = vmatprep.subr.bf16.mxu0 %v817_v0 }
  0x7c   :  { %637 = vmatpush3.bf16.msra.mxu0 %v687_v35 }
  0x7d   :  { %638 = vmatprep.subr.bf16.mxu0 %v817_v0 }
  0x80   :  { %639 = vmatpush3.bf16.msra.mxu0 %v688_v36 }
  0x81   :  { %640 = vmatprep.subr.bf16.mxu0 %v817_v0 }
  0x84   :  { %641 = vmatpush3.bf16.msra.mxu0 %v689_v49 }
  0x85   :  { %642 = vmatprep.subr.bf16.mxu0 %v817_v0 }
  0x88   :  { %643 = vmatpush3.bf16.msra.mxu0 %v690_v50 }
 0x13e   :  { %v584_v37 = vpop.f32.mrb[0].mxu0 }
 0x13f   :  { %v585_v39 = vpop.f32.mrb[1].mxu0 }
 0x140   :  { %v586_v40 = vadd.f32 %v585_v39, %v584_v37  ;;  %v587_v41 = vpop.f32.mrb[2].mxu0 }
 0x141   :  { %v588_v42 = vpop.f32.mrb[3].mxu0 }
 0x142   :  { %v259_v43 = vadd.f32 %v586_v40, %v524_v38  ;;  %v589_v44 = vadd.f32 %v588_v42, %v587_v41 }
 0x144   :  { %v262_v45 = vadd.f32 %v589_v44, %v524_v38  ;;  %v265_v46 = vmax.f32 %v259_v43, 0.0 }
 0x146   :  { %v266_v47 = vmax.f32 %v262_v45, 0.0 }
 0x148   :  { %v267_v48 = vpack.c.bf16 %v266_v47, %v265_v46 }
 0x14a   :  { %625 = vmatmul.mubr.bf16.vlgmr.msra.gmra.mrb[0].mxu1 %v267_v48 }
 0x21d   :  { %v373_v52 = vpop.f32.mrb[0].mxu1 }
 0x21e   :  { %v374_v53 = vadd.f32 %v541_v51, %v373_v52  ;;  %v626_v54 = vpop.f32.mrb[1].mxu1 }
 0x21f   :  { %v376_v55 = vpop.f32.mrb[2].mxu1 }
 0x220   :  { %v377_v56 = vadd.f32 %v541_v51, %v376_v55  ;;  %v627_v57 = vpop.f32.mrb[3].mxu1  ;;  %v380_v58 = vmax.f32 %v374_v53, 0.0 }
 0x222   :  { %v381_v59 = vmax.f32 %v377_v56, 0.0 }
 0x224   :  { %v382_v60 = vpack.c.bf16 %v381_v59, %v380_v58 }
 0x226   :  { %645 = vmatmul.mubr.bf16.vlgmr.msra.gmra.mrb[4].mxu0 %v382_v60 }
 0x2f9   :  { %v488_v62 = vpop.f32.mrb[4].mxu0 }
 0x2fa   :  { %v646_v63 = vpop.f32.mrb[5].mxu0  ;;  %v489_v1 = vadd.f32 %v550_v61, %v488_v62 }
 0x2fb   :  { %v491_v0 = vpop.f32.mrb[6].mxu0 }
 0x2fc   :  { %v492_v2 = vadd.f32 %v550_v61, %v491_v0  ;;  %v647_v3 = vpop.f32.mrb[7].mxu0 }
 0x2fe   :  { %v566_v4 = vpack.c.bf16 %v492_v2, %v489_v1 }
 0x300   :  { %567 = vst [vmem:[#allocation10] sm:$0xff] %v566_v4  }
 0x301   :  { %790 = shalt.err (!%p787_p8)
}
 0x302   :  { %s791_s14 = scalar_lea.hbm %s973_s7, 128 }
 0x303   :  { %p792_p9 = scmp.ne.s32.totalorder %s973_s7, %s791_s14  ;;  %p795_p10 = scmp.lt.u32.totalorder %s791_s14, %s973_s7 }
 0x305   :  { %p797_p11 = pnand %p795_p10, %p792_p9 }
 0x307   :  { %800 = shalt.err (!%p797_p11)
}
 0x308   :  { %516 = dma.vmem_to_hbm [thread:$0]  %s511_s10, 128, %s973_s7, [#allocation4], %s810_s11, %s810_s11, %s811_s12  }
 0x309   :  { %807 = dma.done.wait [#allocation4], 128  }
 0x30a   :  { %808 = vsyncadd [#allocation4], 4294967168 }
 0x30b   :  { %520 = vsyncpa [#allocation3], 1 }
 0x30c   :  { %521 = vsyncpa [#allocation6], 1 }
 0x30d   :  { %522 = vsyncpa [#allocation9], 1 }
 0x30e   :  { %523 = vsyncpa [#allocation4], 1 }

// kernel: tpu_custom_call.1
= control target key start
LH: loop header
LB: loop body
LE: loop exit
PB: predicated region body
PF: predicated region fallthrough
CT: control target
= control target key end

     0   :  { %12 = vsyncpa [#allocation3], 0  ;;  %s966_s0 = inlined_call_operand.hbm [shape: f32[16,256], index: 0, kind: input, shape index: {}]   ;;  %s967_s1 = inlined_call_operand.hbm [shape: bf16[256,128], index: 1, kind: input, shape index: {}]   ;;  %s968_s2 = inlined_call_operand.vmem [shape: f32[1,128], index: 2, kind: input, shape index: {}]   ;;  %s969_s3 = inlined_call_operand.hbm [shape: bf16[128,128], index: 3, kind: input, shape index: {}]   ;;  %s970_s4 = inlined_call_operand.vmem [shape: f32[1,128], index: 4, kind: input, shape index: {}]   ;;  %s971_s5 = inlined_call_operand.hbm [shape: bf16[128,128], index: 5, kind: input, shape index: {}]   ;;  %s972_s6 = inlined_call_operand.vmem [shape: f32[1,128], index: 6, kind: input, shape index: {}]   ;;  %s973_s7 = inlined_call_operand.hbm [shape: bf16[16,128], index: 7, kind: output, shape index: {}]  }
   0x1   :  { %13 = vsyncpa [#allocation6], 0 }
   0x2   :  { %14 = vsyncpa [#allocation9], 0 }
   0x3   :  { %15 = vsyncpa [#allocation4], 0  ;;  %s809_s24 = smov [#allocation5]   ;;  %s691_s28 = scalar_lea.hbm %s967_s1, 2048 }
   0x4   :  { %s33_s25 = sshll.u32 %s809_s24, 4  ;;  %p692_p0 = scmp.ne.s32.totalorder %s967_s1, %s691_s28  ;;  %s34_s25 = int_to_ptr.vmem [resolvable:$true] %s33_s25 }
   0x5   :  { %p695_p1 = scmp.lt.u32.totalorder %s691_s28, %s967_s1 }
   0x7   :  { %p697_p2 = pnand %p695_p1, %p692_p0 }
   0x9   :  { %700 = shalt.err (!%p697_p2)
}
   0xa   :  { %s701_s10 = scalar_lea.vmem %s34_s25, 2048  ;;  %p706_p4 = scmp.lt.s32.totalorder %s34_s25, %s34_s25 }
   0xb   :  { %p702_p3 = scmp.ne.s32.totalorder %s34_s25, %s701_s10  ;;  %p707_p5 = scmp.lt.s32.totalorder %s701_s10, %s701_s10 }
   0xd   :  { %p708_p6 = por %p707_p5, %p706_p4 }
   0xf   :  { %p709_p7 = pnand %p708_p6, %p702_p3 }
  0x11   :  { %712 = shalt.err (!%p709_p7)
}
  0x12   :  { %s810_s11 = smov 64   ;;  %s811_s12 = smov 4  }
  0x13   :  { %39 = dma.hbm_to_vmem [thread:$0]  %s967_s1, 2048, %s34_s25, [#allocation6], %s810_s11, %s810_s11, %s811_s12  }
  0x14   :  { %s812_s15 = smov [#allocation2]   ;;  %s713_s19 = scalar_lea.hbm %s966_s0, 512 }
  0x15   :  { %s21_s16 = sshll.u32 %s812_s15, 4  ;;  %p714_p8 = scmp.ne.s32.totalorder %s966_s0, %s713_s19  ;;  %s22_s16 = int_to_ptr.vmem [resolvable:$true] %s21_s16 }
  0x16   :  { %p717_p9 = scmp.lt.u32.totalorder %s713_s19, %s966_s0 }
  0x18   :  { %p719_p10 = pnand %p717_p9, %p714_p8 }
  0x1a   :  { %722 = shalt.err (!%p719_p10)
}
  0x1b   :  { %s723_s24 = scalar_lea.vmem %s22_s16, 512  ;;  %p728_p12 = scmp.lt.s32.totalorder %s22_s16, %s22_s16 }
  0x1c   :  { %p724_p11 = scmp.ne.s32.totalorder %s22_s16, %s723_s24  ;;  %p729_p13 = scmp.lt.s32.totalorder %s723_s24, %s723_s24 }
  0x1e   :  { %p730_p0 = por %p729_p13, %p728_p12 }
  0x20   :  { %p731_p1 = pnand %p730_p0, %p724_p11 }
  0x22   :  { %734 = shalt.err (!%p731_p1)
}
  0x23   :  { %s813_s1 = smov 256   ;;  %s814_s25 = smov 16  }
  0x24   :  { %27 = dma.hbm_to_vmem [thread:$0]  %s966_s0, 512, %s22_s16, [#allocation3], %s813_s1, %s813_s1, %s814_s25  }
  0x25   :  { %s815_s28 = smov [#allocation7]   ;;  %s816_s30 = smov [#allocation8]  }
  0x26   :  { %s47_s29 = sshll.u32 %s815_s28, 4  ;;  %s61_s8 = sshll.u32 %s816_s30, 4  ;;  %s48_s29 = int_to_ptr.vmem [resolvable:$true] %s47_s29  ;;  %s887_s8 = int_to_ptr.vmem [resolvable:$true] %s61_s8 }
  0x27   :  { %s735_s13 = scalar_lea.hbm %s969_s3, 1024 }
  0x28   :  { %p736_p2 = scmp.ne.s32.totalorder %s969_s3, %s735_s13  ;;  %p739_p3 = scmp.lt.u32.totalorder %s735_s13, %s969_s3 }
  0x2a   :  { %p741_p4 = pnand %p739_p3, %p736_p2 }
  0x2c   :  { %744 = shalt.err (!%p741_p4)
}
  0x2d   :  { %s745_s0 = scalar_lea.vmem %s48_s29, 1024  ;;  %p750_p6 = scmp.lt.s32.totalorder %s48_s29, %s48_s29 }
  0x2e   :  { %p746_p5 = scmp.ne.s32.totalorder %s48_s29, %s745_s0  ;;  %p751_p7 = scmp.lt.s32.totalorder %s745_s0, %s745_s0 }
  0x30   :  { %p752_p8 = por %p751_p7, %p750_p6 }
  0x32   :  { %p753_p9 = pnand %p752_p8, %p746_p5 }
  0x34   :  { %756 = shalt.err (!%p753_p9)
}
  0x35   :  { %53 = dma.hbm_to_vmem [thread:$0]  %s969_s3, 1024, %s48_s29, [#allocation6], %s810_s11, %s810_s11, %s811_s12  }
  0x36   :  { %s757_s22 = scalar_lea.hbm %s971_s5, 1024 }
  0x37   :  { %p758_p10 = scmp.ne.s32.totalorder %s971_s5, %s757_s22  ;;  %p761_p11 = scmp.lt.u32.totalorder %s757_s22, %s971_s5 }
  0x39   :  { %p763_p12 = pnand %p761_p11, %p758_p10 }
  0x3b   :  { %766 = shalt.err (!%p763_p12)
}
  0x3c   :  { %s767_s26 = scalar_lea.vmem %s887_s8, 1024  ;;  %p772_p0 = scmp.lt.s32.totalorder %s887_s8, %s887_s8 }
  0x3d   :  { %p768_p13 = scmp.ne.s32.totalorder %s887_s8, %s767_s26  ;;  %p773_p1 = scmp.lt.s32.totalorder %s767_s26, %s767_s26 }
  0x3f   :  { %p774_p2 = por %p773_p1, %p772_p0 }
  0x41   :  { %p775_p3 = pnand %p774_p2, %p768_p13 }
  0x43   :  { %778 = shalt.err (!%p775_p3)
}
  0x44   :  { %67 = dma.hbm_to_vmem [thread:$0]  %s971_s5, 1024, %s887_s8, [#allocation9], %s810_s11, %s810_s11, %s811_s12  }
  0x45   :  { %801 = dma.done.wait [#allocation3], 512  }
  0x46   :  { %802 = vsyncadd [#allocation3], 4294966784 }
  0x47   :  { %803 = dma.done.wait [#allocation6], 3072  }
  0x48   :  { %804 = vsyncadd [#allocation6], 4294964224 }
  0x49   :  { %805 = dma.done.wait [#allocation9], 1024  }
  0x4a   :  { %806 = vsyncadd [#allocation9], 4294966272  ;;  %v817_v0 = vmov 0.0   ;;  %v659_v1 = vld [vmem:[#allocation5 + $0x40] sm:$0xff]   ;;  %v661_v3 = vld [vmem:[#allocation5 + $0x48] sm:$0xff]   ;;  %vm818_vm0 = vmmov 0  }
  0x4b   :  { %608 = vmatprep.subr.bf16.mxu1 %v817_v0  ;;  %v660_v2 = vld [vmem:[#allocation5] sm:$0xff]   ;;  %568 = vmatprep.subr.bf16.mxu0 %v659_v1  ;;  %v662_v4 = vld [vmem:[#allocation5 + $0x8] sm:$0xff]   ;;  %v663_v5 = vld [vmem:[#allocation5 + $0x50] sm:$0xff]   ;;  %s819_s9 = smov [#allocation10]  }
  0x4c   :  { %569 = vmatpush3.bf16.msra.mxu0 %v660_v2  ;;  %v664_v6 = vld [vmem:[#allocation5 + $0x10] sm:$0xff]   ;;  %v665_v7 = vld [vmem:[#allocation5 + $0x58] sm:$0xff]   ;;  %v667_v9 = vld [vmem:[#allocation5 + $0x60] sm:$0xff]   ;;  %624 = vmatprep.mubr.msk.bf16.mxu1 %vm818_vm0, %v817_v0  ;;  %s510_s10 = sshll.u32 %s819_s9, 4  ;;  %s511_s10 = int_to_ptr.vmem [resolvable:$true] %s510_s10 }
  0x4d   :  { %570 = vmatprep.subr.bf16.mxu0 %v661_v3  ;;  %v666_v8 = vld [vmem:[#allocation5 + $0x18] sm:$0xff]   ;;  %v668_v10 = vld [vmem:[#allocation5 + $0x20] sm:$0xff]   ;;  %v669_v11 = vld [vmem:[#allocation5 + $0x68] sm:$0xff]   ;;  %p784_p5 = scmp.lt.s32.totalorder %s511_s10, %s511_s10 }
  0x4e   :  { %v84_v12 = vld [vmem:[#allocation2 + $0x8] sm:$0xff]  ;;  %v86_v13 = vld [vmem:[#allocation2 + $0x18] sm:$0xff]  ;;  %v675_v16 = vld [vmem:[#allocation7] sm:$0xff]  }
  0x4f   :  { %v670_v14 = vld [vmem:[#allocation5 + $0x28] sm:$0xff]   ;;  %v88_v15 = vpack.c.bf16 %v86_v13, %v84_v12  ;;  %v671_v17 = vld [vmem:[#allocation5 + $0x70] sm:$0xff]   ;;  %609 = vmatpush3.bf16.msra.mxu1 %v675_v16  ;;  %v673_v20 = vld [vmem:[#allocation5 + $0x78] sm:$0xff]  }
  0x50   :  { %571 = vmatpush3.bf16.msra.mxu0 %v662_v4  ;;  %v676_v18 = vld [vmem:[#allocation7 + $0x8] sm:$0xff]   ;;  %v672_v19 = vld [vmem:[#allocation5 + $0x30] sm:$0xff]   ;;  %610 = vmatprep.subr.bf16.mxu1 %v817_v0  ;;  %v674_v22 = vld [vmem:[#allocation5 + $0x38] sm:$0xff]  }
  0x51   :  { %572 = vmatprep.subr.bf16.mxu0 %v663_v5  ;;  %256 = vmatprep.mubr.bf16.mxu0 %v88_v15  ;;  %v677_v21 = vld [vmem:[#allocation7 + $0x10] sm:$0xff]   ;;  %v83_v23 = vld [vmem:[#allocation2] sm:$0xff]  ;;  %v678_v25 = vld [vmem:[#allocation7 + $0x18] sm:$0xff]  }
  0x52   :  { %v85_v24 = vld [vmem:[#allocation2 + $0x10] sm:$0xff]  ;;  %v679_v27 = vld [vmem:[#allocation7 + $0x20] sm:$0xff]   ;;  %v680_v28 = vld [vmem:[#allocation7 + $0x28] sm:$0xff]  }
  0x53   :  { %611 = vmatpush3.bf16.msra.mxu1 %v676_v18  ;;  %v87_v26 = vpack.c.bf16 %v85_v24, %v83_v23  ;;  %v681_v29 = vld [vmem:[#allocation7 + $0x30] sm:$0xff]   ;;  %v682_v30 = vld [vmem:[#allocation7 + $0x38] sm:$0xff]   ;;  %v683_v31 = vld [vmem:[#allocation8] sm:$0xff]  }
  0x54   :  { %573 = vmatpush3.bf16.msra.mxu0 %v664_v6  ;;  %612 = vmatprep.subr.bf16.mxu1 %v817_v0  ;;  %v684_v32 = vld [vmem:[#allocation8 + $0x8] sm:$0xff]   ;;  %v685_v33 = vld [vmem:[#allocation8 + $0x10] sm:$0xff]   ;;  %v686_v34 = vld [vmem:[#allocation8 + $0x18] sm:$0xff]  }
  0x55   :  { %574 = vmatprep.subr.bf16.mxu0 %v665_v7  ;;  %v687_v35 = vld [vmem:[#allocation8 + $0x20] sm:$0xff]   ;;  %v688_v36 = vld [vmem:[#allocation8 + $0x28] sm:$0xff]   ;;  %v689_v49 = vld [vmem:[#allocation8 + $0x30] sm:$0xff]  }
  0x56   :  { %v524_v38 = vld [vmem:[%s968_s2] ss:$0 sm:$0xff]  ;;  %v690_v50 = vld [vmem:[#allocation8 + $0x38] sm:$0xff]  }
  0x57   :  { %613 = vmatpush3.bf16.msra.mxu1 %v677_v21  ;;  %v541_v51 = vld [vmem:[%s970_s4] ss:$0 sm:$0xff]  ;;  %s779_s4 = scalar_lea.vmem %s511_s10, 128 }
  0x58   :  { %575 = vmatpush3.bf16.msra.mxu0 %v666_v8  ;;  %614 = vmatprep.subr.bf16.mxu1 %v817_v0  ;;  %v550_v61 = vld [vmem:[%s972_s6] ss:$0 sm:$0xff]  ;;  %p780_p4 = scmp.ne.s32.totalorder %s511_s10, %s779_s4  ;;  %p785_p6 = scmp.lt.s32.totalorder %s779_s4, %s779_s4 }
  0x59   :  { %576 = vmatprep.subr.bf16.mxu0 %v667_v9 }
  0x5a   :  { %p786_p7 = por %p785_p6, %p784_p5 }
  0x5b   :  { %615 = vmatpush3.bf16.msra.mxu1 %v678_v25 }
  0x5c   :  { %577 = vmatpush3.bf16.msra.mxu0 %v668_v10  ;;  %616 = vmatprep.subr.bf16.mxu1 %v817_v0  ;;  %p787_p8 = pnand %p786_p7, %p780_p4 }
  0x5d   :  { %578 = vmatprep.subr.bf16.mxu0 %v669_v11 }
  0x5f   :  { %617 = vmatpush3.bf16.msra.mxu1 %v679_v27 }
  0x60   :  { %579 = vmatpush3.bf16.msra.mxu0 %v670_v14  ;;  %618 = vmatprep.subr.bf16.mxu1 %v817_v0 }
  0x61   :  { %580 = vmatprep.subr.bf16.mxu0 %v671_v17 }
  0x63   :  { %619 = vmatpush3.bf16.msra.mxu1 %v680_v28 }
  0x64   :  { %581 = vmatpush3.bf16.msra.mxu0 %v672_v19  ;;  %620 = vmatprep.subr.bf16.mxu1 %v817_v0 }
  0x65   :  { %582 = vmatprep.subr.bf16.mxu0 %v673_v20 }
  0x67   :  { %621 = vmatpush3.bf16.msra.mxu1 %v681_v29 }
  0x68   :  { %583 = vmatpush3.bf16.msra.mxu0 %v674_v22  ;;  %622 = vmatprep.subr.bf16.mxu1 %v817_v0 }
  0x69   :  { %628 = vmatprep.subr.bf16.mxu0 %v817_v0 }
  0x6b   :  { %257 = vmatmul.mubr.bf16.vlgmr.msra.gmra.mrb[0].mxu0 %v87_v26  ;;  %623 = vmatpush3.bf16.msra.mxu1 %v682_v30 }
  0x6c   :  { %644 = vmatprep.mubr.msk.bf16.mxu0 %vm818_vm0, %v817_v0  ;;  %629 = vmatpush3.bf16.msra.mxu0 %v683_v31 }
  0x6d   :  { %630 = vmatprep.subr.bf16.mxu0 %v817_v0 }
  0x70   :  { %631 = vmatpush3.bf16.msra.mxu0 %v684_v32 }
  0x71   :  { %632 = vmatprep.subr.bf16.mxu0 %v817_v0 }
  0x74   :  { %633 = vmatpush3.bf16.msra.mxu0 %v685_v33 }
  0x75   :  { %634 = vmatprep.subr.bf16.mxu0 %v817_v0 }
  0x78   :  { %635 = vmatpush3.bf16.msra.mxu0 %v686_v34 }
  0x79   :  { %636 = vmatprep.subr.bf16.mxu0 %v817_v0 }
  0x7c   :  { %637 = vmatpush3.bf16.msra.mxu0 %v687_v35 }
  0x7d   :  { %638 = vmatprep.subr.bf16.mxu0 %v817_v0 }
  0x80   :  { %639 = vmatpush3.bf16.msra.mxu0 %v688_v36 }
  0x81   :  { %640 = vmatprep.subr.bf16.mxu0 %v817_v0 }
  0x84   :  { %641 = vmatpush3.bf16.msra.mxu0 %v689_v49 }
  0x85   :  { %642 = vmatprep.subr.bf16.mxu0 %v817_v0 }
  0x88   :  { %643 = vmatpush3.bf16.msra.mxu0 %v690_v50 }
 0x13e   :  { %v584_v37 = vpop.f32.mrb[0].mxu0 }
 0x13f   :  { %v585_v39 = vpop.f32.mrb[1].mxu0 }
 0x140   :  { %v586_v40 = vadd.f32 %v585_v39, %v584_v37  ;;  %v587_v41 = vpop.f32.mrb[2].mxu0 }
 0x141   :  { %v588_v42 = vpop.f32.mrb[3].mxu0 }
 0x142   :  { %v259_v43 = vadd.f32 %v586_v40, %v524_v38  ;;  %v589_v44 = vadd.f32 %v588_v42, %v587_v41 }
 0x144   :  { %v262_v45 = vadd.f32 %v589_v44, %v524_v38  ;;  %v265_v46 = vmax.f32 %v259_v43, 0.0 }
 0x146   :  { %v266_v47 = vmax.f32 %v262_v45, 0.0 }
 0x148   :  { %v267_v48 = vpack.c.bf16 %v266_v47, %v265_v46 }
 0x14a   :  { %625 = vmatmul.mubr.bf16.vlgmr.msra.gmra.mrb[0].mxu1 %v267_v48 }
 0x21d   :  { %v373_v52 = vpop.f32.mrb[0].mxu1 }
 0x21e   :  { %v374_v53 = vadd.f32 %v541_v51, %v373_v52  ;;  %v626_v54 = vpop.f32.mrb[1].mxu1 }
 0x21f   :  { %v376_v55 = vpop.f32.mrb[2].mxu1 }
 0x220   :  { %v377_v56 = vadd.f32 %v541_v51, %v376_v55  ;;  %v627_v57 = vpop.f32.mrb[3].mxu1  ;;  %v380_v58 = vmax.f32 %v374_v53, 0.0 }
 0x222   :  { %v381_v59 = vmax.f32 %v377_v56, 0.0 }
 0x224   :  { %v382_v60 = vpack.c.bf16 %v381_v59, %v380_v58 }
 0x226   :  { %645 = vmatmul.mubr.bf16.vlgmr.msra.gmra.mrb[4].mxu0 %v382_v60 }
 0x2f9   :  { %v488_v62 = vpop.f32.mrb[4].mxu0 }
 0x2fa   :  { %v646_v63 = vpop.f32.mrb[5].mxu0  ;;  %v489_v1 = vadd.f32 %v550_v61, %v488_v62 }
 0x2fb   :  { %v491_v0 = vpop.f32.mrb[6].mxu0 }
 0x2fc   :  { %v492_v2 = vadd.f32 %v550_v61, %v491_v0  ;;  %v647_v3 = vpop.f32.mrb[7].mxu0 }
 0x2fe   :  { %v566_v4 = vpack.c.bf16 %v492_v2, %v489_v1 }
 0x300   :  { %567 = vst [vmem:[#allocation10] sm:$0xff] %v566_v4  }
 0x301   :  { %790 = shalt.err (!%p787_p8)
}
 0x302   :  { %s791_s14 = scalar_lea.hbm %s973_s7, 128 }
 0x303   :  { %p792_p9 = scmp.ne.s32.totalorder %s973_s7, %s791_s14  ;;  %p795_p10 = scmp.lt.u32.totalorder %s791_s14, %s973_s7 }
 0x305   :  { %p797_p11 = pnand %p795_p10, %p792_p9 }
 0x307   :  { %800 = shalt.err (!%p797_p11)
}
 0x308   :  { %516 = dma.vmem_to_hbm [thread:$0]  %s511_s10, 128, %s973_s7, [#allocation4], %s810_s11, %s810_s11, %s811_s12  }
 0x309   :  { %807 = dma.done.wait [#allocation4], 128  }
 0x30a   :  { %808 = vsyncadd [#allocation4], 4294967168 }
 0x30b   :  { %520 = vsyncpa [#allocation3], 1 }
 0x30c   :  { %521 = vsyncpa [#allocation6], 1 }
 0x30d   :  { %522 = vsyncpa [#allocation9], 1 }
 0x30e   :  { %523 = vsyncpa [#allocation4], 1 }

</bundles_post_ra>
